<compile_context>
chip_gen: v6e
topology: v6e:2x2x1
jax: 0.10.0
libtpu: 0.0.40
codegen_flags: <defaults>
</compile_context>

<pallas_src>
import functools

import jax
import jax.numpy as jnp
from jax import lax
from jax.experimental import pallas as pl
from jax.experimental.pallas import tpu as pltpu

_EPS = 1e-12  # matches torch.nn.functional.normalize default eps


def _round_up(x, m):
    return (x + m - 1) // m * m


# --------------------------------------------------------------------------- kernel
def coda_prompt_kernel(x_ref, ank_ref, aa_ref, p_ref, out_ref, aqk_ref):
    # aq_k is computed once per batch tile (j == 0) and cached in VMEM scratch
    # across the LD-column grid axis (axis 1, "arbitrary").
    @pl.when(pl.program_id(1) == 0)
    def _():
        x = x_ref[...]                                        # (TB, Dk) f32

        # num[b,k] = sum_d x[b,d] * (A*nK)[k,d] -- contract shared last dim, no
        # XLU transpose. HIGHEST precision keeps f32 parity with torch normalize.
        num = lax.dot_general(
            x, ank_ref[...], (((1,), (1,)), ((), ())),
            precision=lax.Precision.HIGHEST,
            preferred_element_type=jnp.float32)               # (TB, Ke)

        # den2[b,k] = sum_d x[b,d]^2 * A[k,d]^2  == ||x * A_k||^2.
        # NOTE: squared-sum in f32 can lose precision / overflow earlier than
        # torch's norm-of-product for huge-magnitude activations; fine for
        # ViT-scale embeddings.
        den2 = lax.dot_general(
            x * x, aa_ref[...], (((1,), (1,)), ((), ())),
            precision=lax.Precision.HIGHEST,
            preferred_element_type=jnp.float32)               # (TB, Ke)

        # normalize: num / max(den, eps) == num * rsqrt(max(den^2, eps^2));
        # rsqrt issues on the EUP slot and co-schedules with MXU/VPU work.
        aqk_ref[...] = num * lax.rsqrt(jnp.maximum(den2, _EPS * _EPS))

    # Dominant term: P_[:, j-tile] = aq_k @ p_flat[:, j-tile].  bf16 operands,
    # f32 accumulation, bf16 writeback (kernel is HBM-writeback bound).
    out = lax.dot_general(
        aqk_ref[...].astype(jnp.bfloat16), p_ref[...],
        (((1,), (0,)), ((), ())),
        preferred_element_type=jnp.float32)                   # (TB, TLD)
    out_ref[...] = out.astype(out_ref.dtype)


# ----------------------------------------------------------------- tiling heuristics
def _vmem_budget_bytes():
    """~75% of physical VMEM; 64 MiB fallback is safe on every chip (v7x included)."""
    try:
        cap = int(pltpu.get_tpu_info().vmem_capacity_bytes)
    except Exception:
        cap = 64 * 1024 * 1024
    return (cap * 3) // 4


def _choose_tiles(B, Dk, LD, Ke, out_bytes, budget):
    """Pick (TB, B_pad, TLD, p_buffers) so the working set fits the VMEM budget.

    Goals (perf review):
      * avoid padding B (skips the post-kernel out[:B] copy) whenever possible,
      * keep >=2 batch-grid steps when B allows it (v7x megacore sharding),
      * tile LD columns (lane-dense 128-multiples) only when p_flat + out tiles
        would starve the batch tile,
      * TB up to 512 on 128-MiB-VMEM parts (mem-bound => bigger tile ~ roofline).
    """
    def per_row(tld):
        # x (2 buf, f32) + out tile (2 buf) + f32 matmul accumulator + aq_k/num/den2
        return 2 * Dk * 4 + 2 * tld * out_bytes + tld * 4 + 4 * Ke * 4

    small_w = 2 * Ke * Dk * 4                       # AnK + AA resident
    tb_floor = min(64, _round_up(B, 8))

    # --- LD tile: keep the whole LD resident unless that starves the batch tile.
    tld = LD
    if small_w + Ke * LD * 2 + tb_floor * per_row(LD) > budget and LD % 128 == 0:
        for cand in range(LD - 128, 0, -128):
            if LD % cand == 0 and (
                    small_w + 2 * Ke * cand * 2 + tb_floor * per_row(cand) <= budget):
                tld = cand
                break
    p_buffers = 1 if tld == LD else 2
    avail = budget - small_w - p_buffers * Ke * tld * 2
    tb_cap = max(8, min(512, (avail // per_row(tld)) // 8 * 8))

    # --- batch tile.
    if B <= tb_cap:
        if B >= 16 and B % 16 == 0 and B // 2 <= tb_cap:
            return B // 2, B, tld, p_buffers        # 2 steps, no padding (megacore)
        return B, B, tld, p_buffers                 # 1 step, no padding, no out[:B]
    tb = tb_cap
    return tb, _round_up(B, tb), tld, p_buffers


# ------------------------------------------------------------- weight preprocessing
def prepare_coda_weights(params, l, *, e_pool_size, n_tasks, task_count,
                         e_p_length, emb_d):
    """Once-per-(layer, task) weight preprocessing, hoisted out of the kernel.

    Pads the effective pool slice to a static 128-aligned size so the (TB, Ke)
    intermediates are lane-dense, the MXU K dim is full, and kernel shapes never
    change as task_count grows (no per-task recompiles); zero rows contribute 0.
    """
    K = params[f'e_k_{l}']
    A = params[f'e_a_{l}']
    p = params[f'e_p_{l}']

    pt = e_pool_size // n_tasks
    f = (task_count + 1) * pt
    # eval slicing: K[0:f], A[0:f], p[0:f]
    K, A, p = K[:f], A[:f], p[:f]
    # TODO(synk): train=True detach()/clone() slicing and the ortho_penalty loss are
    # training-only autograd bookkeeping; only the inference compute is kernelized.

    nK = K / jnp.maximum(jnp.linalg.norm(K, axis=1, keepdims=True), _EPS)
    AnK = (A * nK).astype(jnp.float32)              # (f, Dk)
    AA = (A * A).astype(jnp.float32)                # (f, Dk)
    p_flat = p.reshape(f, e_p_length * emb_d).astype(jnp.bfloat16)

    Ke_pad = _round_up(e_pool_size, 128)            # lane-dense, static across tasks
    pad = Ke_pad - f
    if pad > 0:
        AnK = jnp.pad(AnK, ((0, pad), (0, 0)))
        AA = jnp.pad(AA, ((0, pad), (0, 0)))
        p_flat = jnp.pad(p_flat, ((0, pad), (0, 0)))
    return AnK, AA, p_flat


# ------------------------------------------------------------------------ entry point
@functools.partial(jax.jit, static_argnames=("e_p_length", "emb_d", "out_dtype"))
def _coda_prompt_pallas(x_querry, AnK, AA, p_flat, *, e_p_length, emb_d,
                        out_dtype=jnp.bfloat16):
    B, Dk = x_querry.shape
    Ke = AnK.shape[0]
    LD = e_p_length * emb_d
    out_bytes = jnp.dtype(out_dtype).itemsize

    budget = _vmem_budget_bytes()
    TB, B_pad, TLD, p_buffers = _choose_tiles(B, Dk, LD, Ke, out_bytes, budget)
    nb = B_pad // TB
    nj = LD // TLD

    x = x_querry.astype(jnp.float32)
    if B_pad != B:
        x = jnp.pad(x, ((0, B_pad - B), (0, 0)))    # zero rows -> zero outputs

    # Single-buffer the constant-index weight specs only when their second pipeline
    # buffer would waste material VMEM (headroom goes to a bigger TB instead).
    weight_bytes = 2 * Ke * Dk * 4 + (Ke * TLD * 2 if nj == 1 else 0)
    single_buffer_weights = weight_bytes > 8 * 1024 * 1024

    def _const_spec(shape):
        if single_buffer_weights:
            return pl.BlockSpec(shape, lambda i, j: (0, 0),
                                pipeline_mode=pl.Buffered(1))
        return pl.BlockSpec(shape, lambda i, j: (0, 0))

    if nj == 1 and single_buffer_weights:
        p_spec = pl.BlockSpec((Ke, TLD), lambda i, j: (0, j),
                              pipeline_mode=pl.Buffered(1))
    else:
        p_spec = pl.BlockSpec((Ke, TLD), lambda i, j: (0, j))

    cost = pl.CostEstimate(
        flops=int(2 * B_pad * Ke * (2 * Dk + LD)),
        transcendentals=int(B_pad * Ke),
        bytes_accessed=int(B_pad * Dk * 4 + 2 * Ke * Dk * 4 + Ke * LD * 2
                           + B_pad * LD * out_bytes),
    )

    out = pl.pallas_call(
        coda_prompt_kernel,
        out_shape=jax.ShapeDtypeStruct((B_pad, LD), out_dtype),
        grid_spec=pltpu.PrefetchScalarGridSpec(
            num_scalar_prefetch=0,
            grid=(nb, nj),
            in_specs=[
                pl.BlockSpec((TB, Dk), lambda i, j: (i, 0)),   # x: tiled over batch
                _const_spec((Ke, Dk)),                         # AnK: VMEM-resident
                _const_spec((Ke, Dk)),                         # AA : VMEM-resident
                p_spec,                                        # p  : bf16, LD-tiled
            ],
            out_specs=pl.BlockSpec((TB, TLD), lambda i, j: (i, j)),
            scratch_shapes=[pltpu.VMEM((TB, Ke), jnp.float32)],  # cached aq_k
        ),
        compiler_params=pltpu.CompilerParams(
            # batch axis shards across TensorCores (v7x megacore); LD axis carries
            # the aq_k scratch so it must stay "arbitrary".
            dimension_semantics=("parallel", "arbitrary"),
            vmem_limit_bytes=int(budget),
        ),
        cost_estimate=cost,
    )(x, AnK, AA, p_flat)

    if B_pad != B:
        # TODO(synk): only taken when no 8-aligned TB divides B; slice copies (B,LD).
        out = out[:B]
    return out


def coda_prompt_forward(x_querry, l, x_block, prepared, *, e_layers,
                        e_p_length, emb_d, out_dtype=jnp.bfloat16):
    """Replicates CodaPrompt.forward (eval path: train=False).

    `prepared` maps layer -> (AnK, AA, p_flat) from prepare_coda_weights.
    Ek/Ev are returned in `out_dtype` (bf16 by default — prompts are consumed by
    bf16 attention downstream; pass jnp.float32 for exact torch dtype parity).
    """
    if l not in e_layers:
        return None, 0.0, x_block

    AnK, AA, p_flat = prepared[l]
    B = x_querry.shape[0]
    out = _coda_prompt_pallas(x_querry, AnK, AA, p_flat,
                              e_p_length=e_p_length, emb_d=emb_d,
                              out_dtype=out_dtype)

    P_ = out.reshape(B, e_p_length, emb_d)
    i_half = e_p_length // 2
    Ek = P_[:, :i_half, :]
    Ev = P_[:, i_half:, :]
    return [Ek, Ev], 0.0, x_block


# --------------------------------------------------------------------- test helpers
def gram_schmidt_init(key, pool, dim, pt):
    """Deterministic stand-in for __init__'s uniform_ + gram_schmidt (task_count=0):
    rows [0, pt) are random orthonormal vectors, remaining rows are zero."""
    g = jax.random.normal(key, (dim, pt), dtype=jnp.float32)
    q, _ = jnp.linalg.qr(g)                          # (dim, pt), orthonormal columns
    out = jnp.zeros((pool, dim), jnp.float32)
    out = out.at[:pt].set(q.T)
    return out


def _reference_forward(x, A, K, p):
    """Plain-JAX replica of the PyTorch einsum path for verification."""
    a_q = jnp.einsum('bd,kd->bkd', x, A)
    nK = K / jnp.maximum(jnp.linalg.norm(K, axis=1, keepdims=True), _EPS)
    q = a_q / jnp.maximum(jnp.linalg.norm(a_q, axis=2, keepdims=True), _EPS)
    aq_k = jnp.einsum('bkd,kd->bk', q, nK)
    return jnp.einsum('bk,kld->bld', aq_k, p)


if __name__ == "__main__":
    # Small, module-consistent shapes.
    emb_d = 32
    key_dim = 32
    n_tasks = 2
    e_pool_size = 8      # prompt_param[0]
    e_p_length = 8       # prompt_param[1]
    ortho_mu = 0.0       # prompt_param[2]
    e_layers = [0, 1, 2, 3, 4]
    task_count = 0
    pt = e_pool_size // n_tasks

    key = jax.random.PRNGKey(0)
    params = {}
    for e in e_layers:
        key, k1, k2, k3 = jax.random.split(key, 4)
        params[f'e_p_{e}'] = gram_schmidt_init(
            k1, e_pool_size, e_p_length * emb_d, pt).reshape(e_pool_size, e_p_length, emb_d)
        params[f'e_k_{e}'] = gram_schmidt_init(k2, e_pool_size, key_dim, pt)
        params[f'e_a_{e}'] = gram_schmidt_init(k3, e_pool_size, key_dim, pt)

    # Hoisted, once-per-task weight preprocessing for every prompted layer.
    prepared = {
        e: prepare_coda_weights(params, e, e_pool_size=e_pool_size, n_tasks=n_tasks,
                                task_count=task_count, e_p_length=e_p_length,
                                emb_d=emb_d)
        for e in e_layers
    }

    B = 2
    key, kx, kb = jax.random.split(key, 3)
    x_querry = jax.random.normal(kx, (B, key_dim), jnp.float32)
    x_block = jax.random.normal(kb, (B, 16, emb_d), jnp.float32)

    layer = 0
    p_return, loss, xb = coda_prompt_forward(
        x_querry, layer, x_block, prepared,
        e_layers=e_layers, e_p_length=e_p_length, emb_d=emb_d)

    Ek, Ev = p_return
    jax.block_until_ready((Ek, Ev, xb))

    # Cross-check against plain-JAX reference of the exact PyTorch einsum semantics
    # (bf16 output => slightly looser tolerance).
    f_eff = (task_count + 1) * pt
    P_ref = _reference_forward(
        x_querry, params[f'e_a_{layer}'][:f_eff],
        params[f'e_k_{layer}'][:f_eff], params[f'e_p_{layer}'][:f_eff])
    i_half = e_p_length // 2
    assert Ek.shape == (B, i_half, emb_d) and Ev.shape == (B, e_p_length - i_half, emb_d)
    got = jnp.concatenate([Ek, Ev], axis=1).astype(jnp.float32)
    assert jnp.allclose(got, P_ref, rtol=2e-2, atol=2e-2)
    assert jnp.array_equal(xb, x_block)

    print("KERNEL_OK")
</pallas_src>

<mosaic_0001>
module attributes {stable_mosaic.version = 11 : i64} {
  func.func @coda_prompt_kernel(%arg0: i32, %arg1: i32, %arg2: memref<2x32xf32, #tpu.memory_space<vmem>>, %arg3: memref<128x32xf32, #tpu.memory_space<vmem>>, %arg4: memref<128x32xf32, #tpu.memory_space<vmem>>, %arg5: memref<128x256xbf16, #tpu.memory_space<vmem>>, %arg6: memref<2x256xbf16, #tpu.memory_space<vmem>>, %arg7: memref<2x128xf32, #tpu.memory_space<vmem>>) attributes {dimension_semantics = [#tpu.dimension_semantics<parallel>, #tpu.dimension_semantics<arbitrary>], iteration_bounds = array<i64: 1, 1>, scalar_prefetch = 0 : i64, scratch_operands = 1 : i64, tpu.core_type = #tpu.core_type<tc>, window_params = [{transform_indices = @transform_0, window_bounds = array<i64: 2, 32>}, {pipeline_mode = #tpu.pipeline_mode<synchronous>, transform_indices = @transform_1, window_bounds = array<i64: 128, 32>}, {pipeline_mode = #tpu.pipeline_mode<synchronous>, transform_indices = @transform_2, window_bounds = array<i64: 128, 32>}, {transform_indices = @transform_3, window_bounds = array<i64: 128, 256>}, {transform_indices = @transform_4, window_bounds = array<i64: 2, 256>}]} {
    %c0_i32 = arith.constant 0 : i32
    %0 = arith.cmpi eq, %arg1, %c0_i32 : i32
    %1 = arith.extui %0 : i1 to i32
    %c0_i32_0 = arith.constant 0 : i32
    %2 = arith.cmpi ne, %1, %c0_i32_0 : i32
    scf.if %2 {
      %c0_6 = arith.constant 0 : index
      %c0_7 = arith.constant 0 : index
      %9 = vector.load %arg2[%c0_6, %c0_7] : memref<2x32xf32, #tpu.memory_space<vmem>>, vector<2x32xf32>
      %c0_8 = arith.constant 0 : index
      %c0_9 = arith.constant 0 : index
      %10 = vector.load %arg3[%c0_8, %c0_9] : memref<128x32xf32, #tpu.memory_space<vmem>>, vector<128x32xf32>
      %cst_10 = arith.constant dense<0.000000e+00> : vector<2x128xf32>
      %11 = tpu.matmul %9, %10, %cst_10 {dimension_numbers = #tpu.dot_dimension_numbers<[1], [1], [0], [0], [0, 0, 1, 0], [], []>, precision = #tpu.contract_precision<fp32>} : vector<2x32xf32>, vector<128x32xf32>, vector<2x128xf32> -> vector<2x128xf32>
      %12 = arith.mulf %9, %9 : vector<2x32xf32>
      %c0_11 = arith.constant 0 : index
      %c0_12 = arith.constant 0 : index
      %13 = vector.load %arg4[%c0_11, %c0_12] : memref<128x32xf32, #tpu.memory_space<vmem>>, vector<128x32xf32>
      %cst_13 = arith.constant dense<0.000000e+00> : vector<2x128xf32>
      %14 = tpu.matmul %12, %13, %cst_13 {dimension_numbers = #tpu.dot_dimension_numbers<[1], [1], [0], [0], [0, 0, 1, 0], [], []>, precision = #tpu.contract_precision<fp32>} : vector<2x32xf32>, vector<128x32xf32>, vector<2x128xf32> -> vector<2x128xf32>
      %cst_14 = arith.constant 1.000000e-24 : f32
      %15 = vector.broadcast %cst_14 : f32 to vector<2x128xf32>
      %16 = arith.maximumf %14, %15 : vector<2x128xf32>
      %17 = math.rsqrt %16 : vector<2x128xf32>
      %18 = arith.mulf %11, %17 : vector<2x128xf32>
      %c0_15 = arith.constant 0 : index
      %c0_16 = arith.constant 0 : index
      %19 = vector.load %arg7[%c0_15, %c0_16] : memref<2x128xf32, #tpu.memory_space<vmem>>, vector<2x128xf32>
      tpu.vector_store %arg7[%c0_15, %c0_16], %18 {strides = array<i32>} : memref<2x128xf32, #tpu.memory_space<vmem>>, vector<2x128xf32>,
    } else {
    }
    %c0 = arith.constant 0 : index
    %c0_1 = arith.constant 0 : index
    %3 = vector.load %arg7[%c0, %c0_1] : memref<2x128xf32, #tpu.memory_space<vmem>>, vector<2x128xf32>
    %4 = arith.truncf %3 : vector<2x128xf32> to vector<2x128xbf16>
    %c0_2 = arith.constant 0 : index
    %c0_3 = arith.constant 0 : index
    %5 = vector.load %arg5[%c0_2, %c0_3] : memref<128x256xbf16, #tpu.memory_space<vmem>>, vector<128x256xbf16>
    %cst = arith.constant dense<0.000000e+00> : vector<2x256xf32>
    %6 = tpu.matmul %4, %5, %cst {dimension_numbers = #tpu.dot_dimension_numbers<[1], [0], [0], [1], [0, 0, 1, 1], [], []>} : vector<2x128xbf16>, vector<128x256xbf16>, vector<2x256xf32> -> vector<2x256xf32>
    %7 = arith.truncf %6 : vector<2x256xf32> to vector<2x256xbf16>
    %c0_4 = arith.constant 0 : index
    %c0_5 = arith.constant 0 : index
    %8 = vector.load %arg6[%c0_4, %c0_5] : memref<2x256xbf16, #tpu.memory_space<vmem>>, vector<2x256xbf16>
    tpu.vector_store %arg6[%c0_4, %c0_5], %7 {strides = array<i32>} : memref<2x256xbf16, #tpu.memory_space<vmem>>, vector<2x256xbf16>,
    return
  }
  func.func @transform_0(%arg0: i32, %arg1: i32) -> (i32, i32) {
    %c0_i32 = arith.constant 0 : i32
    %c0_i32_0 = arith.constant 0 : i32
    return %arg0, %c0_i32 : i32, i32
  }
  func.func @transform_1(%arg0: i32, %arg1: i32) -> (i32, i32) {
    %c0_i32 = arith.constant 0 : i32
    %c0_i32_0 = arith.constant 0 : i32
    %c0_i32_1 = arith.constant 0 : i32
    return %c0_i32, %c0_i32_0 : i32, i32
  }
  func.func @transform_2(%arg0: i32, %arg1: i32) -> (i32, i32) {
    %c0_i32 = arith.constant 0 : i32
    %c0_i32_0 = arith.constant 0 : i32
    %c0_i32_1 = arith.constant 0 : i32
    return %c0_i32, %c0_i32_0 : i32, i32
  }
  func.func @transform_3(%arg0: i32, %arg1: i32) -> (i32, i32) {
    %c0_i32 = arith.constant 0 : i32
    %c0_i32_0 = arith.constant 0 : i32
    return %c0_i32, %arg1 : i32, i32
  }
  func.func @transform_4(%arg0: i32, %arg1: i32) -> (i32, i32) {
    %c0_i32 = arith.constant 0 : i32
    return %arg0, %arg1 : i32, i32
  }
}

</mosaic_0001>

<bundles_post_ra>
// kernel: _coda_prompt_pallas.1
= control target key start
LH: loop header
LB: loop body
LE: loop exit
PB: predicated region body
PF: predicated region fallthrough
CT: control target
= control target key end

     0   :  { %vm40_vm0 = vcmask 261120   ;;  %v2315_v3 = vmov 0.0   ;;  %vm2316_vm1 = vmmov 0   ;;  %s3260_s0 = inlined_call_operand.vmem [shape: f32[2,32], index: 0, kind: input, shape index: {}]   ;;  %s3261_s1 = inlined_call_operand.vmem [shape: f32[128,32], index: 1, kind: input, shape index: {}]   ;;  %s3262_s2 = inlined_call_operand.vmem [shape: f32[128,32], index: 2, kind: input, shape index: {}]   ;;  %s3263_s3 = inlined_call_operand.vmem [shape: bf16[128,256], index: 3, kind: input, shape index: {}]   ;;  %s3264_s4 = inlined_call_operand.hbm [shape: bf16[2,256], index: 4, kind: output, shape index: {}]  }
   0x1   :  { %v39_v0 = vld [vmem:[%s3261_s1 + $0x78] sm:$0xff]  ;;  %v38_v1 = vld [vmem:[%s3261_s1 + $0x70] sm:$0xff]  ;;  %v37_v2 = vld [vmem:[%s3261_s1 + $0x68] sm:$0xff]  ;;  %1842 = vmatprep.subr.mxu0 %v2315_v3  ;;  %1877 = vmatprep.subr.mxu1 %v2315_v3 }
   0x2   :  { %v90_v4 = vsel %vm40_vm0, %v39_v0, 0  ;;  %v87_v5 = vsel %vm40_vm0, %v38_v1, 0  ;;  %v84_v6 = vsel %vm40_vm0, %v37_v2, 0  ;;  %v36_v7 = vld [vmem:[%s3261_s1 + $0x60] sm:$0xff]  ;;  %v35_v8 = vld [vmem:[%s3261_s1 + $0x58] sm:$0xff]  ;;  %1874 = vmatprep.mubr.msk.f32.mxu0 %vm2316_vm1, %v2315_v3  ;;  %1909 = vmatprep.mubr.msk.f32.mxu1 %vm2316_vm1, %v2315_v3  ;;  %v34_v18 = vld [vmem:[%s3261_s1 + $0x50] sm:$0xff] }
   0x3   :  { %v2365_v9 = vand.u32 4294901760, %v90_v4  ;;  %v2367_v10 = vand.u32 4294901760, %v87_v5  ;;  %v2369_v11 = vand.u32 4294901760, %v84_v6  ;;  %v81_v12 = vsel %vm40_vm0, %v36_v7, 0  ;;  %v33_v21 = vld [vmem:[%s3261_s1 + $0x48] sm:$0xff] }
   0x4   :  { %v2376_v13 = vand.u32 4294901760, %v81_v12  ;;  %v78_v16 = vsel %vm40_vm0, %v35_v8, 0  ;;  %v75_v23 = vsel %vm40_vm0, %v34_v18, 0  ;;  %v72_v30 = vsel %vm40_vm0, %v33_v21, 0 }
   0x5   :  { %1843 = vmatpush3.xpose.msra.mxu0 %v2365_v9  ;;  %v2380_v14 = vsub.f32 %v90_v4, %v2365_v9  ;;  %v2383_v15 = vsub.f32 %v87_v5, %v2367_v10  ;;  %v2387_v17 = vsub.f32 %v84_v6, %v2369_v11  ;;  %v2398_v22 = vand.u32 4294901760, %v78_v16 }
   0x6   :  { %1844 = vmatprep.subr.mxu0 %v2315_v3  ;;  %v2410_v27 = vsub.f32 %v81_v12, %v2376_v13  ;;  %v2413_v29 = vand.u32 4294901760, %v75_v23 }
   0x7   :  { %v186_v19 = vand.u32 4294901760, %v2380_v14  ;;  %v193_v20 = vand.u32 4294901760, %v2383_v15  ;;  %v200_v26 = vand.u32 4294901760, %v2387_v17  ;;  %v2422_v34 = vsub.f32 %v78_v16, %v2398_v22 }
   0x8   :  { %v207_v33 = vand.u32 4294901760, %v2410_v27 }
   0x9   :  { %1845 = vmatpush3.xpose.msra.mxu0 %v2367_v10  ;;  %v187_v24 = vsub.f32 %v2380_v14, %v186_v19  ;;  %v194_v25 = vsub.f32 %v2383_v15, %v193_v20  ;;  %v201_v32 = vsub.f32 %v2387_v17, %v200_v26 }
   0xa   :  { %1846 = vmatprep.subr.mxu0 %v2315_v3 }
   0xb   :  { %v188_v28 = vand.u32 4294901760, %v187_v24  ;;  %v195_v31 = vand.u32 4294901760, %v194_v25 }
   0xd   :  { %1847 = vmatpush3.xpose.msra.mxu0 %v2369_v11  ;;  %1878 = vmatpush3.xpose.msra.mxu1 %v188_v28 }
   0xe   :  { %9 = vsyncpa [#allocation4], 0  ;;  %1848 = vmatprep.subr.mxu0 %v2315_v3  ;;  %1879 = vmatprep.subr.mxu1 %v2315_v3  ;;  %v32_v35 = vld [vmem:[%s3261_s1 + $0x40] sm:$0xff]  ;;  %v2429_v36 = vand.u32 4294901760, %v72_v30  ;;  %v2432_v37 = vsub.f32 %v75_v23, %v2413_v29  ;;  %v202_v38 = vand.u32 4294901760, %v201_v32  ;;  %v208_v39 = vsub.f32 %v2410_v27, %v207_v33  ;;  %v31_v42 = vld [vmem:[%s3261_s1 + $0x38] sm:$0xff] }
   0xf   :  { %v214_v40 = vand.u32 4294901760, %v2422_v34  ;;  %v69_v41 = vsel %vm40_vm0, %v32_v35, 0  ;;  %v66_v47 = vsel %vm40_vm0, %v31_v42, 0  ;;  %v30_v49 = vld [vmem:[%s3261_s1 + $0x30] sm:$0xff]  ;;  %v29_v56 = vld [vmem:[%s3261_s1 + $0x28] sm:$0xff]  ;;  %v28_v63 = vld [vmem:[%s3261_s1 + $0x20] sm:$0xff] }
  0x10   :  { %v2445_v43 = vand.u32 4294901760, %v69_v41  ;;  %v221_v44 = vand.u32 4294901760, %v2432_v37  ;;  %v209_v45 = vand.u32 4294901760, %v208_v39  ;;  %v2454_v48 = vsub.f32 %v72_v30, %v2429_v36  ;;  %v27_v7 = vld [vmem:[%s3261_s1 + $0x18] sm:$0xff]  ;;  %v26_v24 = vld [vmem:[%s3261_s1 + $0x10] sm:$0xff] }
  0x11   :  { %1849 = vmatpush3.xpose.msra.mxu0 %v2376_v13  ;;  %1880 = vmatpush3.xpose.msra.mxu1 %v195_v31  ;;  %v215_v46 = vsub.f32 %v2422_v34, %v214_v40  ;;  %v2464_v51 = vand.u32 4294901760, %v66_v47  ;;  %v63_v54 = vsel %vm40_vm0, %v30_v49, 0  ;;  %v60_v58 = vsel %vm40_vm0, %v29_v56, 0  ;;  %v2544_v39 = vld [vmem:[%s3260_s0] sm:$0x3] }
  0x12   :  { %1850 = vmatprep.subr.mxu0 %v2315_v3  ;;  %1881 = vmatprep.subr.mxu1 %v2315_v3  ;;  %v222_v50 = vsub.f32 %v2432_v37, %v221_v44  ;;  %v228_v53 = vand.u32 4294901760, %v2454_v48  ;;  %v2470_v55 = vsub.f32 %v69_v41, %v2445_v43  ;;  %v2477_v57 = vand.u32 4294901760, %v63_v54 }
  0x13   :  { %v216_v52 = vand.u32 4294901760, %v215_v46  ;;  %v2486_v62 = vsub.f32 %v66_v47, %v2464_v51  ;;  %v2493_v0 = vand.u32 4294901760, %v60_v58  ;;  %v57_v1 = vsel %vm40_vm0, %v28_v63, 0 }
  0x14   :  { %v223_v59 = vand.u32 4294901760, %v222_v50  ;;  %v229_v60 = vsub.f32 %v2454_v48, %v228_v53  ;;  %v235_v61 = vand.u32 4294901760, %v2470_v55  ;;  %v2502_v6 = vsub.f32 %v63_v54, %v2477_v57  ;;  %v24_v50 = vld [vmem:[%s3261_s1] sm:$0xff] }
  0x15   :  { %1851 = vmatpush3.xpose.msra.mxu0 %v2398_v22  ;;  %1882 = vmatpush3.xpose.msra.mxu1 %v202_v38  ;;  %v242_v5 = vand.u32 4294901760, %v2486_v62  ;;  %v2509_v8 = vand.u32 4294901760, %v57_v1  ;;  %v54_v12 = vsel %vm40_vm0, %v27_v7, 0  ;;  %v2518_v23 = vsub.f32 %v60_v58, %v2493_v0  ;;  %v25_v38 = vld [vmem:[%s3261_s1 + $0x8] sm:$0xff] }
  0x16   :  { %1852 = vmatprep.subr.mxu0 %v2315_v3  ;;  %1883 = vmatprep.subr.mxu1 %v2315_v3  ;;  %v230_v2 = vand.u32 4294901760, %v229_v60  ;;  %v236_v4 = vsub.f32 %v2470_v55, %v235_v61  ;;  %v249_v21 = vand.u32 4294901760, %v2502_v6  ;;  %v2525_v25 = vand.u32 4294901760, %v54_v12 }
  0x17   :  { %v243_v18 = vsub.f32 %v2486_v62, %v242_v5  ;;  %v2528_v28 = vsub.f32 %v57_v1, %v2509_v8  ;;  %v256_v32 = vand.u32 4294901760, %v2518_v23  ;;  %v51_v35 = vsel %vm40_vm0, %v26_v24, 0 }
  0x18   :  { %v237_v16 = vand.u32 4294901760, %v236_v4  ;;  %v250_v31 = vsub.f32 %v2502_v6, %v249_v21  ;;  %v2546_v41 = vand.u32 4294901760, %v51_v35  ;;  %v2555_v49 = vsub.f32 %v54_v12, %v2525_v25 }
  0x19   :  { %1853 = vmatpush3.xpose.msra.mxu0 %v2413_v29  ;;  %1884 = vmatpush3.xpose.msra.mxu1 %v209_v45  ;;  %v244_v30 = vand.u32 4294901760, %v243_v18  ;;  %v263_v42 = vand.u32 4294901760, %v2528_v28  ;;  %v48_v45 = vsel %vm40_vm0, %v25_v38, 0  ;;  %v257_v47 = vsub.f32 %v2518_v23, %v256_v32 }
  0x1a   :  { %1854 = vmatprep.subr.mxu0 %v2315_v3  ;;  %1885 = vmatprep.subr.mxu1 %v2315_v3  ;;  %v251_v46 = vand.u32 4294901760, %v250_v31  ;;  %v2564_v54 = vand.u32 4294901760, %v48_v45  ;;  %v45_v56 = vsel %vm40_vm0, %v24_v50, 0  ;;  %v270_v63 = vand.u32 4294901760, %v2555_v49 }
  0x1b   :  { %v264_v60 = vsub.f32 %v2528_v28, %v263_v42  ;;  %v2575_v1 = vsub.f32 %v51_v35, %v2546_v41 }
  0x1c   :  { %v271_v12 = vsub.f32 %v2555_v49, %v270_v63  ;;  %v2590_v18 = vsub.f32 %v48_v45, %v2564_v54 }
  0x1d   :  { %1855 = vmatpush3.xpose.msra.mxu0 %v2429_v36  ;;  %1886 = vmatpush3.xpose.msra.mxu1 %v216_v52  ;;  %v42_v52 = vsel %vm40_vm0, %v2544_v39, 0  ;;  %v265_v7 = vand.u32 4294901760, %v264_v60 }
  0x1e   :  { %1856 = vmatprep.subr.mxu0 %v2315_v3  ;;  %1887 = vmatprep.subr.mxu1 %v2315_v3  ;;  %v2567_v58 = vand.u32 4294901760, %v42_v52  ;;  %v284_v35 = vand.u32 4294901760, %v2590_v18 }
  0x20   :  { %v2582_v4 = vsub.f32 %v42_v52, %v2567_v58 }
  0x21   :  { %1857 = vmatpush3.xpose.msra.mxu0 %v2445_v43  ;;  %1888 = vmatpush3.xpose.msra.mxu1 %v223_v59  ;;  %v258_v59 = vand.u32 4294901760, %v257_v47  ;;  %v285_v47 = vsub.f32 %v2590_v18, %v284_v35 }
  0x22   :  { %1858 = vmatprep.subr.mxu0 %v2315_v3  ;;  %1889 = vmatprep.subr.mxu1 %v2315_v3  ;;  %v175_v24 = vand.u32 4294901760, %v2582_v4 }
  0x24   :  { %v176_v45 = vsub.f32 %v2582_v4, %v175_v24 }
  0x25   :  { %1859 = vmatpush3.xpose.msra.mxu0 %v2464_v51  ;;  %1890 = vmatpush3.xpose.msra.mxu1 %v230_v2  ;;  %v2579_v2 = vand.u32 4294901760, %v45_v56 }
  0x26   :  { %1860 = vmatprep.subr.mxu0 %v2315_v3  ;;  %1891 = vmatprep.subr.mxu1 %v2315_v3  ;;  %v177_v52 = vand.u32 4294901760, %v176_v45 }
  0x27   :  { %v2601_v38 = vsub.f32 %v45_v56, %v2579_v2  ;;  %v286_v56 = vand.u32 4294901760, %v285_v47 }
  0x29   :  { %1861 = vmatpush3.xpose.msra.mxu0 %v2477_v57  ;;  %1892 = vmatpush3.xpose.msra.mxu1 %v237_v16  ;;  %v277_v16 = vand.u32 4294901760, %v2575_v1  ;;  %v291_v50 = vand.u32 4294901760, %v2601_v38 }
  0x2a   :  { %1862 = vmatprep.subr.mxu0 %v2315_v3  ;;  %1893 = vmatprep.subr.mxu1 %v2315_v3 }
  0x2b   :  { %v278_v31 = vsub.f32 %v2575_v1, %v277_v16 }
  0x2d   :  { %1863 = vmatpush3.xpose.msra.mxu0 %v2493_v0  ;;  %1894 = vmatpush3.xpose.msra.mxu1 %v244_v30  ;;  %v272_v30 = vand.u32 4294901760, %v271_v12 }
  0x2e   :  { %1864 = vmatprep.subr.mxu0 %v2315_v3  ;;  %1895 = vmatprep.subr.mxu1 %v2315_v3 }
  0x31   :  { %1865 = vmatpush3.xpose.msra.mxu0 %v2509_v8  ;;  %1896 = vmatpush3.xpose.msra.mxu1 %v251_v46  ;;  %v279_v46 = vand.u32 4294901760, %v278_v31 }
  0x32   :  { %1866 = vmatprep.subr.mxu0 %v2315_v3  ;;  %1897 = vmatprep.subr.mxu1 %v2315_v3 }
  0x35   :  { %1867 = vmatpush3.xpose.msra.mxu0 %v2525_v25  ;;  %1898 = vmatpush3.xpose.msra.mxu1 %v258_v59  ;;  %v292_v59 = vsub.f32 %v2601_v38, %v291_v50 }
  0x36   :  { %1868 = vmatprep.subr.mxu0 %v2315_v3  ;;  %1899 = vmatprep.subr.mxu1 %v2315_v3 }
  0x37   :  { %v293_v60 = vand.u32 4294901760, %v292_v59 }
  0x39   :  { %1869 = vmatpush3.xpose.msra.mxu0 %v2546_v41  ;;  %1900 = vmatpush3.xpose.msra.mxu1 %v265_v7 }
  0x3a   :  { %1870 = vmatprep.subr.mxu0 %v2315_v3  ;;  %1901 = vmatprep.subr.mxu1 %v2315_v3 }
  0x3d   :  { %1871 = vmatpush3.xpose.msra.mxu0 %v2564_v54  ;;  %1902 = vmatpush3.xpose.msra.mxu1 %v272_v30 }
  0x3e   :  { %1872 = vmatprep.subr.mxu0 %v2315_v3  ;;  %1903 = vmatprep.subr.mxu1 %v2315_v3 }
  0x41   :  { %1873 = vmatpush3.xpose.msra.mxu0 %v2579_v2  ;;  %1904 = vmatpush3.xpose.msra.mxu1 %v279_v46  ;;  %v739_v46 = vld [vmem:[%s3262_s2 + $0x28] sm:$0xff] }
  0x42   :  { %1905 = vmatprep.subr.mxu1 %v2315_v3  ;;  %1912 = vmatprep.subr.mxu0 %v2315_v3 }
  0x44   :  { %1875 = vmatmul.mubr.f32.vlgmr.msra.gmra.mxu0 %v177_v52 }
  0x45   :  { %1906 = vmatpush3.xpose.msra.mxu1 %v286_v56  ;;  %1913 = vmatpush3.xpose.msra.mxu0 %v2380_v14 }
  0x46   :  { %1907 = vmatprep.subr.mxu1 %v2315_v3  ;;  %1914 = vmatprep.subr.mxu0 %v2315_v3 }
  0x47   :  { %1944 = vmatprep.mubr.msk.f32.mxu0 %vm2316_vm1, %v2315_v3 }
  0x49   :  { %1908 = vmatpush3.xpose.msra.mxu1 %v293_v60  ;;  %1915 = vmatpush3.xpose.msra.mxu0 %v2383_v15  ;;  %v747_v15 = vld [vmem:[%s3262_s2 + $0x68] sm:$0xff]  ;;  %v769_v60 = vsel %vm40_vm0, %v739_v46, 0 }
  0x4a   :  { %1916 = vmatprep.subr.mxu0 %v2315_v3  ;;  %1947 = vmatprep.subr.mxu1 %v2315_v3 }
  0x4c   :  { %1910 = vmatmul.mubr.f32.vlgmr.msra.gmra.mxu1 %v2567_v58 }
  0x4d   :  { %1917 = vmatpush3.xpose.msra.mxu0 %v2387_v17  ;;  %1948 = vmatpush3.xpose.msra.mxu1 %v2365_v9 }
  0x4e   :  { %1918 = vmatprep.subr.mxu0 %v2315_v3  ;;  %1949 = vmatprep.subr.mxu1 %v2315_v3 }
  0x4f   :  { %1979 = vmatprep.mubr.msk.f32.mxu1 %vm2316_vm1, %v2315_v3 }
  0x51   :  { %1919 = vmatpush3.xpose.msra.mxu0 %v2410_v27  ;;  %1950 = vmatpush3.xpose.msra.mxu1 %v2367_v10 }
  0x52   :  { %1920 = vmatprep.subr.mxu0 %v2315_v3  ;;  %1951 = vmatprep.subr.mxu1 %v2315_v3 }
  0x55   :  { %1921 = vmatpush3.xpose.msra.mxu0 %v2422_v34  ;;  %1952 = vmatpush3.xpose.msra.mxu1 %v2369_v11  ;;  %v745_v34 = vld [vmem:[%s3262_s2 + $0x58] sm:$0xff] }
  0x56   :  { %1922 = vmatprep.subr.mxu0 %v2315_v3  ;;  %1953 = vmatprep.subr.mxu1 %v2315_v3 }
  0x59   :  { %1923 = vmatpush3.xpose.msra.mxu0 %v2432_v37  ;;  %1954 = vmatpush3.xpose.msra.mxu1 %v2376_v13 }
  0x5a   :  { %1924 = vmatprep.subr.mxu0 %v2315_v3  ;;  %1955 = vmatprep.subr.mxu1 %v2315_v3 }
  0x5d   :  { %1925 = vmatpush3.xpose.msra.mxu0 %v2454_v48  ;;  %1956 = vmatpush3.xpose.msra.mxu1 %v2398_v22  ;;  %v744_v48 = vld [vmem:[%s3262_s2 + $0x50] sm:$0xff] }
  0x5e   :  { %1926 = vmatprep.subr.mxu0 %v2315_v3  ;;  %1957 = vmatprep.subr.mxu1 %v2315_v3 }
  0x61   :  { %1927 = vmatpush3.xpose.msra.mxu0 %v2470_v55  ;;  %1958 = vmatpush3.xpose.msra.mxu1 %v2413_v29 }
  0x62   :  { %1928 = vmatprep.subr.mxu0 %v2315_v3  ;;  %1959 = vmatprep.subr.mxu1 %v2315_v3 }
  0x65   :  { %1929 = vmatpush3.xpose.msra.mxu0 %v2486_v62  ;;  %1960 = vmatpush3.xpose.msra.mxu1 %v2429_v36  ;;  %v784_v62 = vsel %vm40_vm0, %v744_v48, 0 }
  0x66   :  { %1930 = vmatprep.subr.mxu0 %v2315_v3  ;;  %1961 = vmatprep.subr.mxu1 %v2315_v3 }
  0x69   :  { %1931 = vmatpush3.xpose.msra.mxu0 %v2502_v6  ;;  %1962 = vmatpush3.xpose.msra.mxu1 %v2445_v43 }
  0x6a   :  { %1932 = vmatprep.subr.mxu0 %v2315_v3  ;;  %1963 = vmatprep.subr.mxu1 %v2315_v3 }
  0x6d   :  { %1933 = vmatpush3.xpose.msra.mxu0 %v2518_v23  ;;  %1964 = vmatpush3.xpose.msra.mxu1 %v2464_v51 }
  0x6e   :  { %1934 = vmatprep.subr.mxu0 %v2315_v3  ;;  %1965 = vmatprep.subr.mxu1 %v2315_v3 }
  0x71   :  { %1935 = vmatpush3.xpose.msra.mxu0 %v2528_v28  ;;  %1966 = vmatpush3.xpose.msra.mxu1 %v2477_v57  ;;  %v742_v28 = vld [vmem:[%s3262_s2 + $0x40] sm:$0xff] }
  0x72   :  { %1936 = vmatprep.subr.mxu0 %v2315_v3  ;;  %1967 = vmatprep.subr.mxu1 %v2315_v3 }
  0x75   :  { %1937 = vmatpush3.xpose.msra.mxu0 %v2555_v49  ;;  %1968 = vmatpush3.xpose.msra.mxu1 %v2493_v0 }
  0x76   :  { %1938 = vmatprep.subr.mxu0 %v2315_v3  ;;  %1969 = vmatprep.subr.mxu1 %v2315_v3 }
  0x79   :  { %1939 = vmatpush3.xpose.msra.mxu0 %v2575_v1  ;;  %1970 = vmatpush3.xpose.msra.mxu1 %v2509_v8 }
  0x7a   :  { %1940 = vmatprep.subr.mxu0 %v2315_v3  ;;  %1971 = vmatprep.subr.mxu1 %v2315_v3 }
  0x7d   :  { %1941 = vmatpush3.xpose.msra.mxu0 %v2590_v18  ;;  %1972 = vmatpush3.xpose.msra.mxu1 %v2525_v25  ;;  %v740_v18 = vld [vmem:[%s3262_s2 + $0x30] sm:$0xff] }
  0x7e   :  { %1942 = vmatprep.subr.mxu0 %v2315_v3  ;;  %1973 = vmatprep.subr.mxu1 %v2315_v3  ;;  %v772_v45 = vsel %vm40_vm0, %v740_v18, 0 }
  0x81   :  { %1943 = vmatpush3.xpose.msra.mxu0 %v2601_v38  ;;  %1974 = vmatpush3.xpose.msra.mxu1 %v2546_v41 }
  0x82   :  { %1975 = vmatprep.subr.mxu1 %v2315_v3  ;;  %1982 = vmatprep.subr.mxu0 %v2315_v3 }
  0x84   :  { %1945 = vmatmul.mubr.f32.vlgmr.msra.gmra.mxu0 %v2582_v4 }
  0x85   :  { %1976 = vmatpush3.xpose.msra.mxu1 %v2564_v54  ;;  %1983 = vmatpush3.xpose.msra.mxu0 %v186_v19 }
  0x86   :  { %1977 = vmatprep.subr.mxu1 %v2315_v3  ;;  %1984 = vmatprep.subr.mxu0 %v2315_v3 }
  0x87   :  { %2014 = vmatprep.mubr.msk.f32.mxu0 %vm2316_vm1, %v2315_v3 }
  0x89   :  { %1978 = vmatpush3.xpose.msra.mxu1 %v2579_v2  ;;  %1985 = vmatpush3.xpose.msra.mxu0 %v193_v20  ;;  %v793_v20 = vsel %vm40_vm0, %v747_v15, 0  ;;  %v2934_v15 = vand.u32 4294901760, %v769_v60 }
  0x8a   :  { %1986 = vmatprep.subr.mxu0 %v2315_v3  ;;  %2017 = vmatprep.subr.mxu1 %v2315_v3  ;;  %v2798_v27 = vand.u32 4294901760, %v793_v20 }
  0x8b   :  { %v2948_v48 = vsub.f32 %v769_v60, %v2934_v15 }
  0x8c   :  { %1980 = vmatmul.mubr.f32.vlgmr.msra.gmra.mxu1 %v175_v24  ;;  %v2812_v37 = vsub.f32 %v793_v20, %v2798_v27 }
  0x8d   :  { %1987 = vmatpush3.xpose.msra.mxu0 %v200_v26  ;;  %2018 = vmatpush3.xpose.msra.mxu1 %v2365_v9  ;;  %v749_v9 = vld [vmem:[%s3262_s2 + $0x78] sm:$0xff] }
  0x8e   :  { %1988 = vmatprep.subr.mxu0 %v2315_v3  ;;  %2019 = vmatprep.subr.mxu1 %v2315_v3 }
  0x8f   :  { %2049 = vmatprep.mubr.msk.f32.mxu1 %vm2316_vm1, %v2315_v3 }
  0x91   :  { %1989 = vmatpush3.xpose.msra.mxu0 %v207_v33  ;;  %2020 = vmatpush3.xpose.msra.mxu1 %v2367_v10  ;;  %v799_v10 = vsel %vm40_vm0, %v749_v9, 0  ;;  %v738_v9 = vld [vmem:[%s3262_s2 + $0x20] sm:$0xff] }
  0x92   :  { %1990 = vmatprep.subr.mxu0 %v2315_v3  ;;  %2021 = vmatprep.subr.mxu1 %v2315_v3 }
  0x95   :  { %1991 = vmatpush3.xpose.msra.mxu0 %v214_v40  ;;  %2022 = vmatpush3.xpose.msra.mxu1 %v2369_v11  ;;  %v748_v11 = vld [vmem:[%s3262_s2 + $0x70] sm:$0xff] }
  0x96   :  { %1992 = vmatprep.subr.mxu0 %v2315_v3  ;;  %2023 = vmatprep.subr.mxu1 %v2315_v3  ;;  %v796_v14 = vsel %vm40_vm0, %v748_v11, 0 }
  0x97   :  { %v2778_v17 = vand.u32 4294901760, %v796_v14 }
  0x99   :  { %1993 = vmatpush3.xpose.msra.mxu0 %v221_v44  ;;  %2024 = vmatpush3.xpose.msra.mxu1 %v2376_v13  ;;  %v2770_v13 = vand.u32 4294901760, %v799_v10  ;;  %v2793_v26 = vsub.f32 %v796_v14, %v2778_v17  ;;  %v787_v44 = vsel %vm40_vm0, %v745_v34, 0 }
  0x9a   :  { %1994 = vmatprep.subr.mxu0 %v2315_v3  ;;  %2025 = vmatprep.subr.mxu1 %v2315_v3 }
  0x9b   :  { %v2784_v19 = vsub.f32 %v799_v10, %v2770_v13 }
  0x9d   :  { %1995 = vmatpush3.xpose.msra.mxu0 %v228_v53  ;;  %2026 = vmatpush3.xpose.msra.mxu1 %v2398_v22  ;;  %v746_v22 = vld [vmem:[%s3262_s2 + $0x60] sm:$0xff]  ;;  %v2830_v53 = vand.u32 4294901760, %v787_v44 }
  0x9e   :  { %1996 = vmatprep.subr.mxu0 %v2315_v3  ;;  %2027 = vmatprep.subr.mxu1 %v2315_v3  ;;  %v790_v33 = vsel %vm40_vm0, %v746_v22, 0  ;;  %v766_v22 = vsel %vm40_vm0, %v738_v9, 0 }
  0x9f   :  { %v2846_v6 = vsub.f32 %v787_v44, %v2830_v53  ;;  %v2943_v34 = vand.u32 4294901760, %v766_v22 }
  0xa1   :  { %1997 = vmatpush3.xpose.msra.mxu0 %v235_v61  ;;  %2028 = vmatpush3.xpose.msra.mxu1 %v2413_v29  ;;  %v895_v29 = vand.u32 4294901760, %v2784_v19  ;;  %v909_v61 = vand.u32 4294901760, %v2812_v37 }
  0xa2   :  { %1998 = vmatprep.subr.mxu0 %v2315_v3  ;;  %2029 = vmatprep.subr.mxu1 %v2315_v3 }
  0xa3   :  { %v896_v40 = vsub.f32 %v2784_v19, %v895_v29 }
  0xa5   :  { %1999 = vmatpush3.xpose.msra.mxu0 %v242_v5  ;;  %2030 = vmatpush3.xpose.msra.mxu1 %v2429_v36  ;;  %v902_v36 = vand.u32 4294901760, %v2793_v26  ;;  %v897_v55 = vand.u32 4294901760, %v896_v40 }
  0xa6   :  { %2000 = vmatprep.subr.mxu0 %v2315_v3  ;;  %2031 = vmatprep.subr.mxu1 %v2315_v3 }
  0xa9   :  { %2001 = vmatpush3.xpose.msra.mxu0 %v249_v21  ;;  %2032 = vmatpush3.xpose.msra.mxu1 %v2445_v43  ;;  %v2817_v43 = vand.u32 4294901760, %v790_v33  ;;  %v2852_v21 = vand.u32 4294901760, %v784_v62 }
  0xaa   :  { %2002 = vmatprep.subr.mxu0 %v2315_v3  ;;  %2033 = vmatprep.subr.mxu1 %v2315_v3 }
  0xab   :  { %v2868_v49 = vsub.f32 %v784_v62, %v2852_v21  ;;  %v736_v62 = vld [vmem:[%s3262_s2 + $0x10] sm:$0xff] }
  0xad   :  { %2003 = vmatpush3.xpose.msra.mxu0 %v256_v32  ;;  %2034 = vmatpush3.xpose.msra.mxu1 %v2464_v51  ;;  %v903_v51 = vsub.f32 %v2793_v26, %v902_v36  ;;  %v930_v12 = vand.u32 4294901760, %v2868_v49 }
  0xae   :  { %2004 = vmatprep.subr.mxu0 %v2315_v3  ;;  %2035 = vmatprep.subr.mxu1 %v2315_v3 }
  0xaf   :  { %v904_v5 = vand.u32 4294901760, %v903_v51 }
  0xb1   :  { %2005 = vmatpush3.xpose.msra.mxu0 %v263_v42  ;;  %2036 = vmatpush3.xpose.msra.mxu1 %v2477_v57  ;;  %v2835_v57 = vsub.f32 %v790_v33, %v2817_v43  ;;  %v737_v33 = vld [vmem:[%s3262_s2 + $0x18] sm:$0xff] }
  0xb2   :  { %2006 = vmatprep.subr.mxu0 %v2315_v3  ;;  %2037 = vmatprep.subr.mxu1 %v2315_v3 }
  0xb3   :  { %v916_v23 = vand.u32 4294901760, %v2835_v57 }
  0xb5   :  { %2007 = vmatpush3.xpose.msra.mxu0 %v270_v63  ;;  %2038 = vmatpush3.xpose.msra.mxu1 %v2493_v0  ;;  %v743_v0 = vld [vmem:[%s3262_s2 + $0x48] sm:$0xff]  ;;  %v741_v63 = vld [vmem:[%s3262_s2 + $0x38] sm:$0xff] }
  0xb6   :  { %2008 = vmatprep.subr.mxu0 %v2315_v3  ;;  %2039 = vmatprep.subr.mxu1 %v2315_v3 }
  0xb9   :  { %2009 = vmatpush3.xpose.msra.mxu0 %v277_v16  ;;  %2040 = vmatpush3.xpose.msra.mxu1 %v2509_v8  ;;  %v910_v8 = vsub.f32 %v2812_v37, %v909_v61  ;;  %v775_v16 = vsel %vm40_vm0, %v741_v63, 0 }
  0xba   :  { %2010 = vmatprep.subr.mxu0 %v2315_v3  ;;  %2041 = vmatprep.subr.mxu1 %v2315_v3  ;;  %v2903_v38 = vand.u32 4294901760, %v775_v16 }
  0xbb   :  { %v911_v42 = vand.u32 4294901760, %v910_v8  ;;  %v733_v8 = vmul.f32 %v2544_v39, %v2544_v39 }
  0xbc   :  { %v2918_v56 = vsub.f32 %v775_v16, %v2903_v38 }
  0xbd   :  { %2011 = vmatpush3.xpose.msra.mxu0 %v284_v35  ;;  %2042 = vmatpush3.xpose.msra.mxu1 %v2525_v25  ;;  %v781_v25 = vsel %vm40_vm0, %v743_v0, 0  ;;  %v931_v35 = vsub.f32 %v2868_v49, %v930_v12  ;;  %v2960_v0 = vsub.f32 %v766_v22, %v2943_v34  ;;  %v751_v18 = vsel %vm40_vm0, %v733_v8, 0 }
  0xbe   :  { %2012 = vmatprep.subr.mxu0 %v2315_v3  ;;  %2043 = vmatprep.subr.mxu1 %v2315_v3  ;;  %v2863_v32 = vand.u32 4294901760, %v781_v25  ;;  %v951_v20 = vand.u32 4294901760, %v2918_v56  ;;  %v2997_v46 = vand.u32 4294901760, %v751_v18 }
  0xbf   :  { %v932_v52 = vand.u32 4294901760, %v931_v35  ;;  %v972_v39 = vand.u32 4294901760, %v2960_v0  ;;  %v734_v35 = vld [vmem:[%s3262_s2] sm:$0xff] }
  0xc0   :  { %v2880_v1 = vsub.f32 %v781_v25, %v2863_v32  ;;  %v952_v51 = vsub.f32 %v2918_v56, %v951_v20  ;;  %v3010_v22 = vsub.f32 %v751_v18, %v2997_v46 }
  0xc1   :  { %2013 = vmatpush3.xpose.msra.mxu0 %v291_v50  ;;  %2044 = vmatpush3.xpose.msra.mxu1 %v2546_v41  ;;  %v923_v41 = vand.u32 4294901760, %v2846_v6  ;;  %v2914_v50 = vand.u32 4294901760, %v772_v45 }
  0xc2   :  { %2045 = vmatprep.subr.mxu1 %v2315_v3  ;;  %2052 = vmatprep.subr.mxu0 %v2315_v3  ;;  %v937_v30 = vand.u32 4294901760, %v2880_v1  ;;  %v953_v25 = vand.u32 4294901760, %v952_v51 }
  0xc3   :  { %v2928_v11 = vsub.f32 %v772_v45, %v2914_v50  ;;  %v973_v45 = vsub.f32 %v2960_v0, %v972_v39 }
  0xc4   :  { %2015 = vmatmul.mubr.f32.vlgmr.msra.gmra.mxu0 %v2567_v58  ;;  %v938_v47 = vsub.f32 %v2880_v1, %v937_v30 }
  0xc5   :  { %2046 = vmatpush3.xpose.msra.mxu1 %v2564_v54  ;;  %2053 = vmatpush3.xpose.msra.mxu0 %v2770_v13  ;;  %v917_v54 = vsub.f32 %v2835_v57, %v916_v23  ;;  %v958_v40 = vand.u32 4294901760, %v2928_v11 }
  0xc6   :  { %2047 = vmatprep.subr.mxu1 %v2315_v3  ;;  %2054 = vmatprep.subr.mxu0 %v2315_v3  ;;  %v939_v10 = vand.u32 4294901760, %v938_v47 }
  0xc7   :  { %2084 = vmatprep.mubr.msk.f32.mxu0 %vm2316_vm1, %v2315_v3  ;;  %v918_v4 = vand.u32 4294901760, %v917_v54  ;;  %v760_v54 = vsel %vm40_vm0, %v736_v62, 0  ;;  %v884_v62 = vand.u32 4294901760, %v3010_v22 }
  0xc8   :  { %v2985_v16 = vand.u32 4294901760, %v760_v54 }
  0xc9   :  { %2048 = vmatpush3.xpose.msra.mxu1 %v2579_v2  ;;  %2055 = vmatpush3.xpose.msra.mxu0 %v2778_v17  ;;  %v924_v2 = vsub.f32 %v2846_v6, %v923_v41 }
  0xca   :  { %2056 = vmatprep.subr.mxu0 %v2315_v3  ;;  %2087 = vmatprep.subr.mxu1 %v2315_v3 }
  0xcb   :  { %v925_v24 = vand.u32 4294901760, %v924_v2 }
  0xcc   :  { %2050 = vmatmul.mubr.f32.vlgmr.msra.gmra.mxu1 %v2567_v58  ;;  %v778_v58 = vsel %vm40_vm0, %v742_v28, 0 }
  0xcd   :  { %2057 = vmatpush3.xpose.msra.mxu0 %v2798_v27  ;;  %2088 = vmatpush3.xpose.msra.mxu1 %v897_v55  ;;  %v2886_v7 = vand.u32 4294901760, %v778_v58  ;;  %v763_v55 = vsel %vm40_vm0, %v737_v33, 0 }
  0xce   :  { %2058 = vmatprep.subr.mxu0 %v2315_v3  ;;  %2089 = vmatprep.subr.mxu1 %v2315_v3  ;;  %v2968_v28 = vand.u32 4294901760, %v763_v55 }
  0xcf   :  { %2119 = vmatprep.mubr.msk.f32.mxu1 %vm2316_vm1, %v2315_v3  ;;  %v2898_v31 = vsub.f32 %v778_v58, %v2886_v7  ;;  %v735_v58 = vld [vmem:[%s3262_s2 + $0x8] sm:$0xff] }
  0xd0   :  { %v2980_v2 = vsub.f32 %v763_v55, %v2968_v28 }
  0xd1   :  { %2059 = vmatpush3.xpose.msra.mxu0 %v2817_v43  ;;  %2090 = vmatpush3.xpose.msra.mxu1 %v904_v5  ;;  %v944_v59 = vand.u32 4294901760, %v2898_v31  ;;  %v959_v5 = vsub.f32 %v2928_v11, %v958_v40 }
  0xd2   :  { %2060 = vmatprep.subr.mxu0 %v2315_v3  ;;  %2091 = vmatprep.subr.mxu1 %v2315_v3  ;;  %v979_v9 = vand.u32 4294901760, %v2980_v2 }
  0xd3   :  { %v945_v14 = vsub.f32 %v2898_v31, %v944_v59  ;;  %v960_v63 = vand.u32 4294901760, %v959_v5 }
  0xd5   :  { %2061 = vmatpush3.xpose.msra.mxu0 %v2830_v53  ;;  %2092 = vmatpush3.xpose.msra.mxu1 %v911_v42  ;;  %v946_v44 = vand.u32 4294901760, %v945_v14  ;;  %v965_v42 = vand.u32 4294901760, %v2948_v48  ;;  %v974_v14 = vand.u32 4294901760, %v973_v45 }
  0xd6   :  { %2062 = vmatprep.subr.mxu0 %v2315_v3  ;;  %2093 = vmatprep.subr.mxu1 %v2315_v3 }
  0xd9   :  { %2063 = vmatpush3.xpose.msra.mxu0 %v2852_v21  ;;  %2094 = vmatpush3.xpose.msra.mxu1 %v918_v4  ;;  %v966_v4 = vsub.f32 %v2948_v48, %v965_v42 }
  0xda   :  { %2064 = vmatprep.subr.mxu0 %v2315_v3  ;;  %2095 = vmatprep.subr.mxu1 %v2315_v3 }
  0xdb   :  { %v967_v47 = vand.u32 4294901760, %v966_v4 }
  0xdd   :  { %2065 = vmatpush3.xpose.msra.mxu0 %v2863_v32  ;;  %2096 = vmatpush3.xpose.msra.mxu1 %v925_v24  ;;  %v757_v24 = vsel %vm40_vm0, %v735_v58, 0  ;;  %v885_v58 = vsub.f32 %v3010_v22, %v884_v62 }
  0xde   :  { %2066 = vmatprep.subr.mxu0 %v2315_v3  ;;  %2097 = vmatprep.subr.mxu1 %v2315_v3  ;;  %v3003_v60 = vand.u32 4294901760, %v757_v24 }
  0xe0   :  { %v3014_v33 = vsub.f32 %v757_v24, %v3003_v60  ;;  %v886_v24 = vand.u32 4294901760, %v885_v58 }
  0xe1   :  { %2067 = vmatpush3.xpose.msra.mxu0 %v2886_v7  ;;  %2098 = vmatpush3.xpose.msra.mxu1 %v932_v52  ;;  %v3001_v52 = vsub.f32 %v760_v54, %v2985_v16 }
  0xe2   :  { %2068 = vmatprep.subr.mxu0 %v2315_v3  ;;  %2099 = vmatprep.subr.mxu1 %v2315_v3  ;;  %v993_v54 = vand.u32 4294901760, %v3014_v33 }
  0xe3   :  { %v986_v55 = vand.u32 4294901760, %v3001_v52 }
  0xe4   :  { %v994_v4 = vsub.f32 %v3014_v33, %v993_v54 }
  0xe5   :  { %2069 = vmatpush3.xpose.msra.mxu0 %v2903_v38  ;;  %2100 = vmatpush3.xpose.msra.mxu1 %v939_v10  ;;  %v754_v10 = vsel %vm40_vm0, %v734_v35, 0 }
  0xe6   :  { %2070 = vmatprep.subr.mxu0 %v2315_v3  ;;  %2101 = vmatprep.subr.mxu1 %v2315_v3  ;;  %v3019_v51 = vand.u32 4294901760, %v754_v10  ;;  %v995_v35 = vand.u32 4294901760, %v994_v4 }
  0xe8   :  { %v3027_v8 = vsub.f32 %v754_v10, %v3019_v51 }
  0xe9   :  { %2071 = vmatpush3.xpose.msra.mxu0 %v2914_v50  ;;  %2102 = vmatpush3.xpose.msra.mxu1 %v946_v44  ;;  %v980_v44 = vsub.f32 %v2980_v2, %v979_v9 }
  0xea   :  { %2072 = vmatprep.subr.mxu0 %v2315_v3  ;;  %2103 = vmatprep.subr.mxu1 %v2315_v3  ;;  %v1000_v18 = vand.u32 4294901760, %v3027_v8 }
  0xeb   :  { %v981_v5 = vand.u32 4294901760, %v980_v44 }
  0xec   :  { %v1001_v45 = vsub.f32 %v3027_v8, %v1000_v18 }
  0xed   :  { %2073 = vmatpush3.xpose.msra.mxu0 %v2934_v15  ;;  %2104 = vmatpush3.xpose.msra.mxu1 %v953_v25  ;;  %v987_v25 = vsub.f32 %v3001_v52, %v986_v55 }
  0xee   :  { %2074 = vmatprep.subr.mxu0 %v2315_v3  ;;  %2105 = vmatprep.subr.mxu1 %v2315_v3  ;;  %v1002_v10 = vand.u32 4294901760, %v1001_v45 }
  0xf1   :  { %2075 = vmatpush3.xpose.msra.mxu0 %v2943_v34  ;;  %2106 = vmatpush3.xpose.msra.mxu1 %v960_v63  ;;  %v988_v63 = vand.u32 4294901760, %v987_v25 }
  0xf2   :  { %2076 = vmatprep.subr.mxu0 %v2315_v3  ;;  %2107 = vmatprep.subr.mxu1 %v2315_v3 }
  0xf5   :  { %2077 = vmatpush3.xpose.msra.mxu0 %v2968_v28  ;;  %2108 = vmatpush3.xpose.msra.mxu1 %v967_v47 }
  0xf6   :  { %2078 = vmatprep.subr.mxu0 %v2315_v3  ;;  %2109 = vmatprep.subr.mxu1 %v2315_v3 }
  0xf9   :  { %2079 = vmatpush3.xpose.msra.mxu0 %v2985_v16  ;;  %2110 = vmatpush3.xpose.msra.mxu1 %v974_v14 }
  0xfa   :  { %2080 = vmatprep.subr.mxu0 %v2315_v3  ;;  %2111 = vmatprep.subr.mxu1 %v2315_v3 }
  0xfd   :  { %2081 = vmatpush3.xpose.msra.mxu0 %v3003_v60  ;;  %2112 = vmatpush3.xpose.msra.mxu1 %v981_v5 }
  0xfe   :  { %2082 = vmatprep.subr.mxu0 %v2315_v3  ;;  %2113 = vmatprep.subr.mxu1 %v2315_v3 }
 0x101   :  { %2083 = vmatpush3.xpose.msra.mxu0 %v3019_v51  ;;  %2114 = vmatpush3.xpose.msra.mxu1 %v988_v63 }
 0x102   :  { %2115 = vmatprep.subr.mxu1 %v2315_v3  ;;  %2122 = vmatprep.subr.mxu0 %v2315_v3 }
 0x104   :  { %2085 = vmatmul.mubr.f32.vlgmr.msra.gmra.mxu0 %v886_v24  ;;  %v179_v47 = vpop.f32.mrf.mxu0 }
 0x105   :  { %2116 = vmatpush3.xpose.msra.mxu1 %v995_v35  ;;  %2123 = vmatpush3.xpose.msra.mxu0 %v2784_v19 }
 0x106   :  { %2117 = vmatprep.subr.mxu1 %v2315_v3  ;;  %2124 = vmatprep.subr.mxu0 %v2315_v3  ;;  %v1876_v14 = vpop.f32.mrf.mxu0 }
 0x107   :  { %2154 = vmatprep.mubr.msk.f32.mxu0 %vm2316_vm1, %v2315_v3 }
 0x109   :  { %2118 = vmatpush3.xpose.msra.mxu1 %v1002_v10  ;;  %2125 = vmatpush3.xpose.msra.mxu0 %v2793_v26 }
 0x10a   :  { %2126 = vmatprep.subr.mxu0 %v2315_v3  ;;  %2157 = vmatprep.subr.mxu1 %v2315_v3 }
 0x10c   :  { %v330_v44 = vpop.f32.mrf.mxu1  ;;  %2120 = vmatmul.mubr.f32.vlgmr.msra.gmra.mxu1 %v2997_v46 }
 0x10d   :  { %v331_v5 = vadd.f32 %v330_v44, %v179_v47  ;;  %2127 = vmatpush3.xpose.msra.mxu0 %v2812_v37  ;;  %2158 = vmatpush3.xpose.msra.mxu1 %v2770_v13 }
 0x10e   :  { %v1911_v25 = vpop.f32.mrf.mxu1  ;;  %2128 = vmatprep.subr.mxu0 %v2315_v3  ;;  %2159 = vmatprep.subr.mxu1 %v2315_v3 }
 0x10f   :  { %2189 = vmatprep.mubr.msk.f32.mxu1 %vm2316_vm1, %v2315_v3 }
 0x111   :  { %2129 = vmatpush3.xpose.msra.mxu0 %v2835_v57  ;;  %2160 = vmatpush3.xpose.msra.mxu1 %v2778_v17  ;;  %v2267_v57 = vld [vmem:[%s3263_s3 + $0x70] ss:$8 sps:$4 sm:$0xff]  }
 0x112   :  { %2130 = vmatprep.subr.mxu0 %v2315_v3  ;;  %2161 = vmatprep.subr.mxu1 %v2315_v3 }
 0x115   :  { %2131 = vmatpush3.xpose.msra.mxu0 %v2846_v6  ;;  %2162 = vmatpush3.xpose.msra.mxu1 %v2798_v27 }
 0x116   :  { %2132 = vmatprep.subr.mxu0 %v2315_v3  ;;  %2163 = vmatprep.subr.mxu1 %v2315_v3 }
 0x119   :  { %2133 = vmatpush3.xpose.msra.mxu0 %v2868_v49  ;;  %2164 = vmatpush3.xpose.msra.mxu1 %v2817_v43  ;;  %v2273_v49 = vld [vmem:[%s3263_s3 + $0x50] ss:$8 sps:$4 sm:$0xff]  }
 0x11a   :  { %2134 = vmatprep.subr.mxu0 %v2315_v3  ;;  %2165 = vmatprep.subr.mxu1 %v2315_v3 }
 0x11d   :  { %2135 = vmatpush3.xpose.msra.mxu0 %v2880_v1  ;;  %2166 = vmatpush3.xpose.msra.mxu1 %v2830_v53  ;;  %v2278_v1 = vld [vmem:[%s3263_s3 + $0x44] ss:$8 sps:$4 sm:$0xff]  }
 0x11e   :  { %2136 = vmatprep.subr.mxu0 %v2315_v3  ;;  %2167 = vmatprep.subr.mxu1 %v2315_v3 }
 0x121   :  { %2137 = vmatpush3.xpose.msra.mxu0 %v2898_v31  ;;  %2168 = vmatpush3.xpose.msra.mxu1 %v2852_v21  ;;  %v2284_v31 = vld [vmem:[%s3263_s3 + $0x24] ss:$8 sps:$4 sm:$0xff]  }
 0x122   :  { %2138 = vmatprep.subr.mxu0 %v2315_v3  ;;  %2169 = vmatprep.subr.mxu1 %v2315_v3 }
 0x125   :  { %2139 = vmatpush3.xpose.msra.mxu0 %v2918_v56  ;;  %2170 = vmatpush3.xpose.msra.mxu1 %v2863_v32  ;;  %v2287_v56 = vld [vmem:[%s3263_s3 + $0x14] ss:$8 sps:$4 sm:$0xff]  }
 0x126   :  { %2140 = vmatprep.subr.mxu0 %v2315_v3  ;;  %2171 = vmatprep.subr.mxu1 %v2315_v3 }
 0x129   :  { %2141 = vmatpush3.xpose.msra.mxu0 %v2928_v11  ;;  %2172 = vmatpush3.xpose.msra.mxu1 %v2886_v7  ;;  %v2317_v11 = vmov 0  }
 0x12a   :  { %2142 = vmatprep.subr.mxu0 %v2315_v3  ;;  %2173 = vmatprep.subr.mxu1 %v2315_v3 }
 0x12d   :  { %2143 = vmatpush3.xpose.msra.mxu0 %v2948_v48  ;;  %2174 = vmatpush3.xpose.msra.mxu1 %v2903_v38 }
 0x12e   :  { %2144 = vmatprep.subr.mxu0 %v2315_v3  ;;  %2175 = vmatprep.subr.mxu1 %v2315_v3 }
 0x131   :  { %2145 = vmatpush3.xpose.msra.mxu0 %v2960_v0  ;;  %2176 = vmatpush3.xpose.msra.mxu1 %v2914_v50 }
 0x132   :  { %2146 = vmatprep.subr.mxu0 %v2315_v3  ;;  %2177 = vmatprep.subr.mxu1 %v2315_v3 }
 0x135   :  { %2147 = vmatpush3.xpose.msra.mxu0 %v2980_v2  ;;  %2178 = vmatpush3.xpose.msra.mxu1 %v2934_v15 }
 0x136   :  { %2148 = vmatprep.subr.mxu0 %v2315_v3  ;;  %2179 = vmatprep.subr.mxu1 %v2315_v3 }
 0x139   :  { %2149 = vmatpush3.xpose.msra.mxu0 %v3001_v52  ;;  %2180 = vmatpush3.xpose.msra.mxu1 %v2943_v34 }
 0x13a   :  { %2150 = vmatprep.subr.mxu0 %v2315_v3  ;;  %2181 = vmatprep.subr.mxu1 %v2315_v3 }
 0x13d   :  { %2151 = vmatpush3.xpose.msra.mxu0 %v3014_v33  ;;  %2182 = vmatpush3.xpose.msra.mxu1 %v2968_v28 }
 0x13e   :  { %2152 = vmatprep.subr.mxu0 %v2315_v3  ;;  %2183 = vmatprep.subr.mxu1 %v2315_v3 }
 0x141   :  { %2153 = vmatpush3.xpose.msra.mxu0 %v3027_v8  ;;  %2184 = vmatpush3.xpose.msra.mxu1 %v2985_v16  ;;  %v1593_v8 = vlaneseq }
 0x142   :  { %2185 = vmatprep.subr.mxu1 %v2315_v3  ;;  %2192 = vmatprep.subr.mxu0 %v2315_v3 }
 0x144   :  { %v434_v58 = vpop.f32.mrf.mxu0  ;;  %2155 = vmatmul.mubr.f32.vlgmr.msra.gmra.mxu0 %v3010_v22 }
 0x145   :  { %v435_v63 = vadd.f32 %v434_v58, %v331_v5  ;;  %2186 = vmatpush3.xpose.msra.mxu1 %v3003_v60  ;;  %2193 = vmatpush3.xpose.msra.mxu0 %v895_v29 }
 0x146   :  { %2187 = vmatprep.subr.mxu1 %v2315_v3  ;;  %2194 = vmatprep.subr.mxu0 %v2315_v3  ;;  %v1946_v4 = vpop.f32.mrf.mxu0 }
 0x147   :  { %2224 = vmatprep.mubr.msk.f32.mxu0 %vm2316_vm1, %v2315_v3 }
 0x149   :  { %2188 = vmatpush3.xpose.msra.mxu1 %v3019_v51  ;;  %2195 = vmatpush3.xpose.msra.mxu0 %v902_v36 }
 0x14a   :  { %2196 = vmatprep.subr.mxu0 %v2315_v3  ;;  %2227 = vmatprep.subr.mxu1 %v2315_v3 }
 0x14c   :  { %v523_v24 = vpop.f32.mrf.mxu1  ;;  %2190 = vmatmul.mubr.f32.vlgmr.msra.gmra.mxu1 %v884_v62 }
 0x14d   :  { %v524_v19 = vadd.f32 %v523_v24, %v435_v63  ;;  %2197 = vmatpush3.xpose.msra.mxu0 %v909_v61  ;;  %2228 = vmatpush3.xpose.msra.mxu1 %v2770_v13  ;;  %v2269_v61 = vld [vmem:[%s3263_s3 + $0x74] ss:$8 sps:$4 sm:$0xff]  }
 0x14e   :  { %v1981_v29 = vpop.f32.mrf.mxu1  ;;  %2198 = vmatprep.subr.mxu0 %v2315_v3  ;;  %2229 = vmatprep.subr.mxu1 %v2315_v3 }
 0x14f   :  { %2259 = vmatprep.mubr.msk.f32.mxu1 %vm2316_vm1, %v2315_v3 }
 0x151   :  { %2199 = vmatpush3.xpose.msra.mxu0 %v916_v23  ;;  %2230 = vmatpush3.xpose.msra.mxu1 %v2778_v17 }
 0x152   :  { %2200 = vmatprep.subr.mxu0 %v2315_v3  ;;  %2231 = vmatprep.subr.mxu1 %v2315_v3 }
 0x155   :  { %2201 = vmatpush3.xpose.msra.mxu0 %v923_v41  ;;  %2232 = vmatpush3.xpose.msra.mxu1 %v2798_v27  ;;  %v2275_v41 = vld [vmem:[%s3263_s3 + $0x54] ss:$8 sps:$4 sm:$0xff]  }
 0x156   :  { %2202 = vmatprep.subr.mxu0 %v2315_v3  ;;  %2233 = vmatprep.subr.mxu1 %v2315_v3 }
 0x159   :  { %2203 = vmatpush3.xpose.msra.mxu0 %v930_v12  ;;  %2234 = vmatpush3.xpose.msra.mxu1 %v2817_v43  ;;  %v2281_v12 = vld [vmem:[%s3263_s3 + $0x34] ss:$8 sps:$4 sm:$0xff]  }
 0x15a   :  { %2204 = vmatprep.subr.mxu0 %v2315_v3  ;;  %2235 = vmatprep.subr.mxu1 %v2315_v3 }
 0x15d   :  { %2205 = vmatpush3.xpose.msra.mxu0 %v937_v30  ;;  %2236 = vmatpush3.xpose.msra.mxu1 %v2830_v53  ;;  %v2279_v30 = vld [vmem:[%s3263_s3 + $0x30] ss:$8 sps:$4 sm:$0xff]  }
 0x15e   :  { %2206 = vmatprep.subr.mxu0 %v2315_v3  ;;  %2237 = vmatprep.subr.mxu1 %v2315_v3 }
 0x161   :  { %2207 = vmatpush3.xpose.msra.mxu0 %v944_v59  ;;  %2238 = vmatpush3.xpose.msra.mxu1 %v2852_v21  ;;  %v2272_v21 = vld [vmem:[%s3263_s3 + $0x64] ss:$8 sps:$4 sm:$0xff]  }
 0x162   :  { %2208 = vmatprep.subr.mxu0 %v2315_v3  ;;  %2239 = vmatprep.subr.mxu1 %v2315_v3  ;;  %v2290_v59 = vld [vmem:[%s3263_s3 + $0x4] ss:$8 sps:$4 sm:$0xff]  }
 0x165   :  { %2209 = vmatpush3.xpose.msra.mxu0 %v951_v20  ;;  %2240 = vmatpush3.xpose.msra.mxu1 %v2863_v32  ;;  %v2270_v32 = vld [vmem:[%s3263_s3 + $0x60] ss:$8 sps:$4 sm:$0xff]  }
 0x166   :  { %2210 = vmatprep.subr.mxu0 %v2315_v3  ;;  %2241 = vmatprep.subr.mxu1 %v2315_v3 }
 0x169   :  { %2211 = vmatpush3.xpose.msra.mxu0 %v958_v40  ;;  %2242 = vmatpush3.xpose.msra.mxu1 %v2886_v7  ;;  %v2276_v7 = vld [vmem:[%s3263_s3 + $0x40] ss:$8 sps:$4 sm:$0xff]  }
 0x16a   :  { %2212 = vmatprep.subr.mxu0 %v2315_v3  ;;  %2243 = vmatprep.subr.mxu1 %v2315_v3 }
 0x16d   :  { %2213 = vmatpush3.xpose.msra.mxu0 %v965_v42  ;;  %2244 = vmatpush3.xpose.msra.mxu1 %v2903_v38  ;;  %v2282_v38 = vld [vmem:[%s3263_s3 + $0x20] ss:$8 sps:$4 sm:$0xff]  }
 0x16e   :  { %2214 = vmatprep.subr.mxu0 %v2315_v3  ;;  %2245 = vmatprep.subr.mxu1 %v2315_v3 }
 0x171   :  { %2215 = vmatpush3.xpose.msra.mxu0 %v972_v39  ;;  %2246 = vmatpush3.xpose.msra.mxu1 %v2914_v50  ;;  %v2285_v50 = vld [vmem:[%s3263_s3 + $0x10] ss:$8 sps:$4 sm:$0xff]  }
 0x172   :  { %2216 = vmatprep.subr.mxu0 %v2315_v3  ;;  %2247 = vmatprep.subr.mxu1 %v2315_v3 }
 0x175   :  { %2217 = vmatpush3.xpose.msra.mxu0 %v979_v9  ;;  %2248 = vmatpush3.xpose.msra.mxu1 %v2934_v15  ;;  %v2288_v15 = vld [vmem:[%s3263_s3] ss:$8 sps:$4 sm:$0xff]   ;;  %s2319_s3 = smov [#allocation3]  }
 0x176   :  { %2218 = vmatprep.subr.mxu0 %v2315_v3  ;;  %2249 = vmatprep.subr.mxu1 %v2315_v3  ;;  %s1612_s27 = sshll.u32 %s2319_s3, 4  ;;  %s1613_s27 = int_to_ptr.vmem [resolvable:$true] %s1612_s27 }
 0x177   :  { %s2293_s28 = scalar_lea.vmem %s1613_s27, 32  ;;  %p2298_p1 = scmp.lt.s32.totalorder %s1613_s27, %s1613_s27 }
 0x178   :  { %p2294_p0 = scmp.ne.s32.totalorder %s1613_s27, %s2293_s28  ;;  %p2299_p2 = scmp.lt.s32.totalorder %s2293_s28, %s2293_s28 }
 0x179   :  { %2219 = vmatpush3.xpose.msra.mxu0 %v986_v55  ;;  %2250 = vmatpush3.xpose.msra.mxu1 %v2943_v34  ;;  %v2318_v55 = vmov 1966171168  }
 0x17a   :  { %2220 = vmatprep.subr.mxu0 %v2315_v3  ;;  %2251 = vmatprep.subr.mxu1 %v2315_v3  ;;  %v1591_v62 = vunpack.c.l.s4 %v2318_v55  ;;  %p2300_p3 = por %p2299_p2, %p2298_p1 }
 0x17c   :  { %p2301_p4 = pnand %p2300_p3, %p2294_p0 }
 0x17d   :  { %2221 = vmatpush3.xpose.msra.mxu0 %v993_v54  ;;  %2252 = vmatpush3.xpose.msra.mxu1 %v2968_v28  ;;  %v1592_v54 = vunpack.c.0.s8 %v1591_v62 }
 0x17e   :  { %2222 = vmatprep.subr.mxu0 %v2315_v3  ;;  %2253 = vmatprep.subr.mxu1 %v2315_v3 }
 0x181   :  { %2223 = vmatpush3.xpose.msra.mxu0 %v1000_v18  ;;  %2254 = vmatpush3.xpose.msra.mxu1 %v2985_v16  ;;  %v1594_v18 = vshrl.u32 %v1593_v8, 7 }
 0x182   :  { %2255 = vmatprep.subr.mxu1 %v2315_v3  ;;  %1544 = vmatprep.subr.bf16.mxu0 %v2269_v61 }
 0x183   :  { %v1595_v45 = vsub.s32 %v1592_v54, %v1594_v18 }
 0x184   :  { %v642_v13 = vpop.f32.mrf.mxu0  ;;  %2225 = vmatmul.mubr.f32.vlgmr.msra.gmra.mxu0 %v2997_v46 }
 0x185   :  { %v643_v17 = vadd.f32 %v642_v13, %v524_v19  ;;  %2256 = vmatpush3.xpose.msra.mxu1 %v3003_v60  ;;  %1545 = vmatpush1.bf16.msra.mxu0 %v2267_v57 }
 0x186   :  { %2257 = vmatprep.subr.mxu1 %v2315_v3  ;;  %v2016_v26 = vpop.f32.mrf.mxu0  ;;  %1546 = vmatprep.subr.bf16.mxu0 %v2272_v21 }
 0x187   :  { %1576 = vmatprep.mubr.bf16.mxu0 %v2317_v11 }
 0x189   :  { %2258 = vmatpush3.xpose.msra.mxu1 %v3019_v51  ;;  %1547 = vmatpush1.bf16.msra.mxu0 %v2270_v32 }
 0x18a   :  { %1548 = vmatprep.subr.bf16.mxu0 %v2275_v41 }
 0x18c   :  { %v729_v27 = vpop.f32.mrf.mxu1  ;;  %2260 = vmatmul.mubr.f32.vlgmr.msra.gmra.mxu1 %v2997_v46 }
 0x18d   :  { %v730_v36 = vadd.f32 %v729_v27, %v643_v17  ;;  %1549 = vmatpush1.bf16.msra.mxu0 %v2273_v49 }
 0x18e   :  { %v2051_v37 = vpop.f32.mrf.mxu1  ;;  %1550 = vmatprep.subr.bf16.mxu0 %v2278_v1 }
 0x191   :  { %1551 = vmatpush1.bf16.msra.mxu0 %v2276_v7 }
 0x192   :  { %1552 = vmatprep.subr.bf16.mxu0 %v2281_v12 }
 0x195   :  { %1553 = vmatpush1.bf16.msra.mxu0 %v2279_v30 }
 0x196   :  { %1554 = vmatprep.subr.bf16.mxu0 %v2284_v31 }
 0x199   :  { %1555 = vmatpush1.bf16.msra.mxu0 %v2282_v38 }
 0x19a   :  { %1556 = vmatprep.subr.bf16.mxu0 %v2287_v56 }
 0x19d   :  { %1557 = vmatpush1.bf16.msra.mxu0 %v2285_v50 }
 0x19e   :  { %1558 = vmatprep.subr.bf16.mxu0 %v2290_v59 }
 0x1a1   :  { %1559 = vmatpush1.bf16.msra.mxu0 %v2288_v15 }
 0x1c4   :  { %v888_v43 = vpop.f32.mrf.mxu0 }
 0x1c6   :  { %v2086_v53 = vpop.f32.mrf.mxu0 }
 0x1cc   :  { %v1039_v3 = vpop.f32.mrf.mxu1 }
 0x1cd   :  { %v1040_v6 = vadd.f32 %v1039_v3, %v888_v43 }
 0x1ce   :  { %v2121_v23 = vpop.f32.mrf.mxu1 }
 0x204   :  { %v1143_v20 = vpop.f32.mrf.mxu0 }
 0x205   :  { %v1144_v34 = vadd.f32 %v1143_v20, %v1040_v6 }
 0x206   :  { %v2156_v40 = vpop.f32.mrf.mxu0 }
 0x20c   :  { %v1232_v48 = vpop.f32.mrf.mxu1 }
 0x20d   :  { %v1233_v39 = vadd.f32 %v1232_v48, %v1144_v34 }
 0x20e   :  { %v2191_v0 = vpop.f32.mrf.mxu1 }
 0x244   :  { %v1351_v28 = vpop.f32.mrf.mxu0 }
 0x245   :  { %v1352_v2 = vadd.f32 %v1351_v28, %v1233_v39 }
 0x246   :  { %v2226_v42 = vpop.f32.mrf.mxu0 }
 0x24c   :  { %v1438_v16 = vpop.f32.mrf.mxu1 }
 0x24d   :  { %v1439_v46 = vadd.f32 %v1438_v16, %v1352_v2 }
 0x24e   :  { %v2261_v52 = vpop.f32.mrf.mxu1 }
 0x24f   :  { %v1442_v60 = vmax.f32 %v1439_v46, 1e-24 }
 0x251   :  { %2291 = vrsqrt.f32 %v1442_v60 }
 0x25e   :  { %v2292_v9 = vpop.eup %2291 }
 0x25f   :  { %v1444_v22 = vmul.f32 %v2292_v9, %v730_v36 }
 0x261   :  { %1445 = vst [vmem:[#allocation2] sm:$0x3] %v1444_v22 }
 0x268   :  { %v1446_v33 = vld [vmem:[#allocation2] sm:$0x3] }
 0x269   :  { %v1447_v51 = vpack.c.bf16 %v1446_v33, %v1446_v33 }
 0x26b   :  { %1577 = vmatmul.mubr.bf16.vlgmr.msra.gmra.mxu0 %v1447_v51 }
 0x32b   :  { %v1578_v35 = vpop.f32.mrf.mxu0 }
 0x32d   :  { %v1580_v47 = vpop.f32.mrf.mxu0 }
 0x32e   :  { %v1636_v10 = vpack.c.bf16 %v1580_v47, %v1578_v35 }
 0x32f   :  { %v1582_v14 = vpop.f32.mrf.mxu0 }
 0x330   :  { %v1596_v44 = vrot.slane %v1636_v10, %v1595_v45 }
 0x331   :  { %v1583_v5 = vpop.f32.mrf.mxu0 }
 0x332   :  { %1637 = vst.sshfl [vmem:[#allocation3] sm:$0x5 pattern:$0x73625140] %v1596_v44 }
 0x333   :  { %2304 = shalt.err (!%p2301_p4)
}
 0x334   :  { %1615 = dma.vmem_to_hbm [thread:$0]  %s1613_s27, 32, %s3264_s4, [#allocation4]  }
 0x335   :  { %2313 = dma.done.wait [#allocation4], 32  }
 0x336   :  { %2314 = vsyncadd [#allocation4], 4294967264 }
 0x337   :  { %1619 = vsyncpa [#allocation4], 1 }

</bundles_post_ra>
